<compile_context>
chip_gen: v5e
topology: v5e:2x2
jax: 0.10.0
libtpu: 0.0.40
codegen_flags: <defaults>
</compile_context>

<pallas_src>
import functools

import jax
import jax.numpy as jnp
from jax.experimental import pallas as pl
from jax.experimental.pallas import tpu as pltpu


def _dropout_kernel(seed_ref, x_ref, o_ref, *, thresh, scale):
    """Process one lane-dense (N, TILE) tile of the flattened activation."""
    j = pl.program_id(0)
    _, tile = x_ref.shape

    # Global feature index of every lane in this tile, shape (1, TILE).
    col = jax.lax.broadcasted_iota(jnp.int32, (1, tile), 1)
    f_idx = (col + j * tile).astype(jnp.uint32)

    seed = seed_ref[0].astype(jnp.uint32)

    # Counter-based 32-bit mixer (splitmix/lowbias-style finalizer).
    # Depends only on (seed, feature index) -> mask is shared across the batch
    # dimension and reproducible regardless of the tiling.
    h = f_idx * jnp.uint32(0x9E3779B1) + seed * jnp.uint32(0x85EBCA77)
    h = h ^ (h >> 16)
    h = h * jnp.uint32(0x7FEB352D)
    h = h ^ (h >> 15)
    h = h * jnp.uint32(0x846CA68B)
    h = h ^ (h >> 16)

    # Bernoulli(keep_prob) via full 32-bit threshold compare; fold the
    # 1/keep_prob rescale into the mask -> single multiply per output element.
    keep = h < jnp.uint32(thresh)
    mask = jnp.where(keep,
                     jnp.asarray(scale, dtype=x_ref.dtype),
                     jnp.asarray(0, dtype=x_ref.dtype))          # (1, TILE)

    o_ref[...] = x_ref[...] * mask                               # broadcast over N


def _choose_tile(n_rows, n_feat, itemsize):
    # Keep each (N, TILE) block around <= ~2 MiB so (input + output) x
    # double-buffering stays inside the scoped-VMEM defaults on every
    # generation (16 MiB v5e, 32 MiB v6e/v7x). Lane dim is a multiple of 128.
    budget_cols = (2 * 1024 * 1024) // max(1, n_rows * itemsize)
    tile = max(128, min(2048, (budget_cols // 128) * 128))
    feat_pad128 = pl.cdiv(n_feat, 128) * 128
    return min(tile, feat_pad128)


def dropout_forward(x, p=0.5, seed=0, training=True):
    """Forward pass of the custom Dropout module. x: (N, C, H, W)."""
    if not training or p <= 0.0:
        return x
    if p >= 1.0:
        # keep_prob == 0: everything dropped (reference module would produce
        # 0/0 = NaN; we return zeros like torch.nn.Dropout).
        return jnp.zeros_like(x)

    keep_prob = 1.0 - p
    n = x.shape[0]
    n_feat = 1
    for d in x.shape[1:]:
        n_feat *= d

    x2 = x.reshape(n, n_feat)

    tile = _choose_tile(n, n_feat, x.dtype.itemsize)
    f_pad = pl.cdiv(n_feat, tile) * tile
    if f_pad != n_feat:
        x2 = jnp.pad(x2, ((0, 0), (0, f_pad - n_feat)))

    thresh = min(int(round(keep_prob * float(2 ** 32))), 2 ** 32 - 1)
    scale = 1.0 / keep_prob
    kernel = functools.partial(_dropout_kernel, thresh=thresh, scale=scale)

    out2 = pl.pallas_call(
        kernel,
        out_shape=jax.ShapeDtypeStruct((n, f_pad), x.dtype),
        grid=(f_pad // tile,),
        in_specs=[
            pl.BlockSpec(memory_space=pltpu.MemorySpace.SMEM),   # seed scalar
            pl.BlockSpec((n, tile), lambda j: (0, j)),           # input tile
        ],
        out_specs=pl.BlockSpec((n, tile), lambda j: (0, j)),
        compiler_params=pltpu.CompilerParams(
            dimension_semantics=("parallel",)),
    )(jnp.asarray([seed], dtype=jnp.int32), x2)

    if f_pad != n_feat:
        out2 = out2[:, :n_feat]
    return out2.reshape(x.shape)


if __name__ == "__main__":
    key = jax.random.PRNGKey(0)
    # Small NCHW input consistent with a CNN feature map: batch=2, channels=4, spatial=16.
    x = jax.random.normal(key, (2, 4, 16, 16), dtype=jnp.float32)

    p = 0.5
    out = jax.block_until_ready(dropout_forward(x, p=p, seed=1234, training=True))

    keep_prob = 1.0 - p
    scaled = x / keep_prob
    is_zero = jnp.abs(out) < 1e-6
    is_scaled = jnp.abs(out - scaled) < 1e-5
    assert bool(jnp.all(is_zero | is_scaled)), "output not in {0, x/(1-p)}"

    # Mask must be shared across the batch dimension (checked where x is clearly nonzero).
    nz = (jnp.abs(x[0]) > 1e-3) & (jnp.abs(x[1]) > 1e-3)
    assert bool(jnp.all(jnp.where(nz, is_scaled[0] == is_scaled[1], True))), \
        "mask not shared across batch"

    # Keep fraction should be plausibly near keep_prob (very loose bound).
    keep_frac = float(jnp.mean(is_scaled[0].astype(jnp.float32)))
    assert 0.2 < keep_frac < 0.8, f"implausible keep fraction {keep_frac}"

    # Eval mode: identity.
    out_eval = jax.block_until_ready(dropout_forward(x, p=p, training=False))
    assert bool(jnp.all(out_eval == x))

    print("KERNEL_OK")
</pallas_src>

<mosaic_0001>
module attributes {stable_mosaic.version = 11 : i64} {
  func.func @_dropout_kernel(%arg0: i32, %arg1: memref<1xi32, #tpu.memory_space<smem>>, %arg2: memref<2x1024xf32, #tpu.memory_space<vmem>>, %arg3: memref<2x1024xf32, #tpu.memory_space<vmem>>) attributes {dimension_semantics = [#tpu.dimension_semantics<parallel>], iteration_bounds = array<i64: 1>, scalar_prefetch = 0 : i64, scratch_operands = 0 : i64, tpu.core_type = #tpu.core_type<tc>, window_params = [{transform_indices = @transform_0, window_bounds = array<i64: 1>}, {transform_indices = @transform_1, window_bounds = array<i64: 2, 1024>}, {transform_indices = @transform_2, window_bounds = array<i64: 2, 1024>}]} {
    %0 = tpu.iota {dimensions = array<i32: 1>} : vector<1x1024xi32>
    %c1024_i32 = arith.constant 1024 : i32
    %1 = arith.muli %arg0, %c1024_i32 : i32
    %2 = vector.broadcast %1 : i32 to vector<1x1024xi32>
    %3 = arith.addi %0, %2 : vector<1x1024xi32>
    %c0 = arith.constant 0 : index
    %4 = memref.load %arg1[%c0] : memref<1xi32, #tpu.memory_space<smem>>
    %c-1640531535_i32 = arith.constant -1640531535 : i32
    %5 = vector.broadcast %c-1640531535_i32 : i32 to vector<1x1024xi32>
    %6 = arith.muli %3, %5 : vector<1x1024xi32>
    %c-2048144777_i32 = arith.constant -2048144777 : i32
    %7 = arith.muli %4, %c-2048144777_i32 : i32
    %8 = vector.broadcast %7 : i32 to vector<1x1024xi32>
    %9 = arith.addi %6, %8 : vector<1x1024xi32>
    %c16_i32 = arith.constant 16 : i32
    %10 = vector.broadcast %c16_i32 : i32 to vector<1x1024xi32>
    %11 = arith.shrui %9, %10 : vector<1x1024xi32>
    %12 = arith.xori %9, %11 : vector<1x1024xi32>
    %c2146121005_i32 = arith.constant 2146121005 : i32
    %13 = vector.broadcast %c2146121005_i32 : i32 to vector<1x1024xi32>
    %14 = arith.muli %12, %13 : vector<1x1024xi32>
    %c15_i32 = arith.constant 15 : i32
    %15 = vector.broadcast %c15_i32 : i32 to vector<1x1024xi32>
    %16 = arith.shrui %14, %15 : vector<1x1024xi32>
    %17 = arith.xori %14, %16 : vector<1x1024xi32>
    %c-2073254261_i32 = arith.constant -2073254261 : i32
    %18 = vector.broadcast %c-2073254261_i32 : i32 to vector<1x1024xi32>
    %19 = arith.muli %17, %18 : vector<1x1024xi32>
    %c16_i32_0 = arith.constant 16 : i32
    %20 = vector.broadcast %c16_i32_0 : i32 to vector<1x1024xi32>
    %21 = arith.shrui %19, %20 : vector<1x1024xi32>
    %22 = arith.xori %19, %21 : vector<1x1024xi32>
    %c-2147483648_i32 = arith.constant -2147483648 : i32
    %23 = vector.broadcast %c-2147483648_i32 : i32 to vector<1x1024xi32>
    %24 = arith.cmpi ult, %22, %23 : vector<1x1024xi32>
    %cst = arith.constant 2.000000e+00 : f32
    %cst_1 = arith.constant 0.000000e+00 : f32
    %25 = vector.broadcast %cst : f32 to vector<1x1024xf32>
    %26 = vector.broadcast %cst_1 : f32 to vector<1x1024xf32>
    %27 = arith.select %24, %25, %26 : vector<1x1024xi1>, vector<1x1024xf32>
    %c0_2 = arith.constant 0 : index
    %c0_3 = arith.constant 0 : index
    %28 = vector.load %arg2[%c0_2, %c0_3] : memref<2x1024xf32, #tpu.memory_space<vmem>>, vector<2x1024xf32>
    %29 = vector.broadcast %27 : vector<1x1024xf32> to vector<2x1024xf32>
    %30 = arith.mulf %28, %29 : vector<2x1024xf32>
    %c0_4 = arith.constant 0 : index
    %c0_5 = arith.constant 0 : index
    %31 = vector.load %arg3[%c0_4, %c0_5] : memref<2x1024xf32, #tpu.memory_space<vmem>>, vector<2x1024xf32>
    tpu.vector_store %arg3[%c0_4, %c0_5], %30 {strides = array<i32>} : memref<2x1024xf32, #tpu.memory_space<vmem>>, vector<2x1024xf32>,
    return
  }
  func.func @transform_0(%arg0: i32) -> i32 {
    %c0_i32 = arith.constant 0 : i32
    %c0_i32_0 = arith.constant 0 : i32
    return %c0_i32 : i32
  }
  func.func @transform_1(%arg0: i32) -> (i32, i32) {
    %c0_i32 = arith.constant 0 : i32
    %c0_i32_0 = arith.constant 0 : i32
    return %c0_i32, %arg0 : i32, i32
  }
  func.func @transform_2(%arg0: i32) -> (i32, i32) {
    %c0_i32 = arith.constant 0 : i32
    %c0_i32_0 = arith.constant 0 : i32
    return %c0_i32, %arg0 : i32, i32
  }
}

</mosaic_0001>

<bundles_post_ra>
// kernel: tpu_custom_call.1
= control target key start
LH: loop header
LB: loop body
LE: loop exit
PB: predicated region body
PF: predicated region fallthrough
CT: control target
= control target key end

     0   :  { %8 = vsyncpa [#allocation4], 0  ;;  %s305_s0 = inlined_call_operand.<no memory space> [shape: s32[1], index: 0, kind: input, shape index: {}]   ;;  %s306_s1 = inlined_call_operand.hbm [shape: f32[2,1024], index: 1, kind: input, shape index: {}]   ;;  %s307_s2 = inlined_call_operand.hbm [shape: f32[2,1024], index: 2, kind: output, shape index: {}]  }
   0x1   :  { %9 = vsyncpa [#allocation5], 0  ;;  %s17_s11 = sshll.u32 %s306_s1, 4  ;;  %s272_s12 = smov [#allocation3]   ;;  %s18_s11 = int_to_ptr.hbm [resolvable:$true] %s17_s11 }
   0x2   :  { %s19_s13 = sshll.u32 %s272_s12, 4  ;;  %s20_s13 = int_to_ptr.vmem [resolvable:$true] %s19_s13 }
   0x3   :  { %22 = dma.hbm_to_vmem [thread:$0]  %s18_s11, 256, %s20_s13, [#allocation4]  }
   0x4   :  { %268 = dma.done.wait [#allocation4], 256  }
   0x5   :  { %269 = vsyncadd [#allocation4], 4294967040  ;;  %v27_v0 = vlaneseq  ;;  %s55_s16 = smul.u32 2246822519, %s305_s0  ;;  %vm177_vm0 = vcmask 1041408   ;;  %vm179_vm1 = vcmask 1045508  }
   0x6   :  { %vm181_vm2 = vcmask 1043456   ;;  %s274_s0 = smov [#allocation6]   ;;  %s199_s19 = sshll.u32 %s307_s2, 4  ;;  %s200_s19 = int_to_ptr.hbm [resolvable:$true] %s199_s19 }
   0x7   :  { %v28_v1 = vand.u32 127, %v27_v0  ;;  %v56_v2 = vstv %s55_s16  ;;  %s197_s1 = sshll.u32 %s274_s0, 4  ;;  %s198_s1 = int_to_ptr.vmem [resolvable:$true] %s197_s1 }
   0x9   :  { %v29_v3 = vadd.s32 128, %v28_v1  ;;  %v30_v4 = vadd.s32 256, %v28_v1  ;;  %v31_v5 = vadd.s32 384, %v28_v1  ;;  %v47_v6 = vmul.u32 2654435761, %v28_v1 }
   0xa   :  { %v32_v7 = vadd.s32 512, %v28_v1  ;;  %v33_v8 = vadd.s32 640, %v28_v1  ;;  %v34_v9 = vadd.s32 768, %v28_v1  ;;  %v35_v10 = vadd.s32 896, %v28_v1 }
   0xb   :  { %v48_v11 = vmul.u32 2654435761, %v29_v3  ;;  %v49_v12 = vmul.u32 2654435761, %v30_v4  ;;  %v50_v13 = vmul.u32 2654435761, %v31_v5  ;;  %v57_v14 = vadd.s32 %v56_v2, %v47_v6 }
   0xc   :  { %v51_v15 = vmul.u32 2654435761, %v32_v7  ;;  %v52_v16 = vmul.u32 2654435761, %v33_v8  ;;  %v53_v21 = vmul.u32 2654435761, %v34_v9 }
   0xd   :  { %v58_v17 = vadd.s32 %v56_v2, %v48_v11  ;;  %v59_v18 = vadd.s32 %v56_v2, %v49_v12  ;;  %v60_v19 = vadd.s32 %v56_v2, %v50_v13  ;;  %v65_v20 = vshrl.u32 %v57_v14, 16 }
   0xe   :  { %v54_v22 = vmul.u32 2654435761, %v35_v10  ;;  %v61_v23 = vadd.s32 %v56_v2, %v51_v15  ;;  %v62_v24 = vadd.s32 %v56_v2, %v52_v16  ;;  %v63_v29 = vadd.s32 %v56_v2, %v53_v21 }
   0xf   :  { %v66_v25 = vshrl.u32 %v58_v17, 16  ;;  %v67_v26 = vshrl.u32 %v59_v18, 16  ;;  %v68_v27 = vshrl.u32 %v60_v19, 16  ;;  %v73_v28 = vxor.u32 %v65_v20, %v57_v14 }
  0x10   :  { %v64_v30 = vadd.s32 %v56_v2, %v54_v22  ;;  %v69_v31 = vshrl.u32 %v61_v23, 16  ;;  %v70_v32 = vshrl.u32 %v62_v24, 16  ;;  %v71_v37 = vshrl.u32 %v63_v29, 16 }
  0x11   :  { %v74_v33 = vxor.u32 %v66_v25, %v58_v17  ;;  %v75_v34 = vxor.u32 %v67_v26, %v59_v18  ;;  %v76_v35 = vxor.u32 %v68_v27, %v60_v19  ;;  %v81_v36 = vmul.u32 2146121005, %v73_v28 }
  0x12   :  { %v72_v38 = vshrl.u32 %v64_v30, 16  ;;  %v77_v39 = vxor.u32 %v69_v31, %v61_v23  ;;  %v78_v40 = vxor.u32 %v70_v32, %v62_v24  ;;  %v79_v45 = vxor.u32 %v71_v37, %v63_v29 }
  0x13   :  { %v82_v41 = vmul.u32 2146121005, %v74_v33  ;;  %v83_v42 = vmul.u32 2146121005, %v75_v34  ;;  %v84_v43 = vmul.u32 2146121005, %v76_v35 }
  0x14   :  { %v89_v44 = vshrl.u32 %v81_v36, 15  ;;  %v80_v46 = vxor.u32 %v72_v38, %v64_v30  ;;  %v85_v47 = vmul.u32 2146121005, %v77_v39  ;;  %v86_v51 = vmul.u32 2146121005, %v78_v40  ;;  %v161_v40 = vld [vmem:[#allocation3] sm:$0xff] }
  0x15   :  { %v90_v48 = vshrl.u32 %v82_v41, 15  ;;  %v91_v49 = vshrl.u32 %v83_v42, 15  ;;  %v92_v50 = vshrl.u32 %v84_v43, 15  ;;  %v87_v53 = vmul.u32 2146121005, %v79_v45 }
  0x16   :  { %v97_v52 = vxor.u32 %v89_v44, %v81_v36  ;;  %v88_v54 = vmul.u32 2146121005, %v80_v46  ;;  %v93_v55 = vshrl.u32 %v85_v47, 15  ;;  %v94_v59 = vshrl.u32 %v86_v51, 15 }
  0x17   :  { %v98_v56 = vxor.u32 %v90_v48, %v82_v41  ;;  %v99_v57 = vxor.u32 %v91_v49, %v83_v42  ;;  %v100_v58 = vxor.u32 %v92_v50, %v84_v43  ;;  %v95_v61 = vshrl.u32 %v87_v53, 15 }
  0x18   :  { %v105_v60 = vmul.u32 2221713035, %v97_v52  ;;  %v96_v62 = vshrl.u32 %v88_v54, 15  ;;  %v101_v63 = vxor.u32 %v93_v55, %v85_v47  ;;  %v102_v3 = vxor.u32 %v94_v59, %v86_v51 }
  0x19   :  { %v106_v0 = vmul.u32 2221713035, %v98_v56  ;;  %v107_v1 = vmul.u32 2221713035, %v99_v57  ;;  %v108_v2 = vmul.u32 2221713035, %v100_v58  ;;  %v103_v5 = vxor.u32 %v95_v61, %v87_v53 }
  0x1a   :  { %v113_v4 = vshrl.u32 %v105_v60, 16  ;;  %v104_v6 = vxor.u32 %v96_v62, %v88_v54  ;;  %v109_v7 = vmul.u32 2221713035, %v101_v63  ;;  %v110_v11 = vmul.u32 2221713035, %v102_v3  ;;  %v162_v54 = vld [vmem:[#allocation3 + $0x8] sm:$0xff] }
  0x1b   :  { %v114_v8 = vshrl.u32 %v106_v0, 16  ;;  %v115_v9 = vshrl.u32 %v107_v1, 16  ;;  %v116_v10 = vshrl.u32 %v108_v2, 16  ;;  %v111_v13 = vmul.u32 2221713035, %v103_v5 }
  0x1c   :  { %v121_v12 = vxor.u32 %v113_v4, %v105_v60  ;;  %v112_v14 = vmul.u32 2221713035, %v104_v6  ;;  %v117_v15 = vshrl.u32 %v109_v7, 16  ;;  %v118_v19 = vshrl.u32 %v110_v11, 16 }
  0x1d   :  { %v122_v16 = vxor.u32 %v114_v8, %v106_v0  ;;  %v123_v17 = vxor.u32 %v115_v9, %v107_v1  ;;  %v124_v18 = vxor.u32 %v116_v10, %v108_v2  ;;  %v119_v21 = vshrl.u32 %v111_v13, 16 }
  0x1e   :  { %v209_v20 = vxor.u32 2147483648, %v121_v12  ;;  %v120_v22 = vshrl.u32 %v112_v14, 16  ;;  %v125_v23 = vxor.u32 %v117_v15, %v109_v7  ;;  %v126_v27 = vxor.u32 %v118_v19, %v110_v11 }
  0x1f   :  { %v210_v24 = vxor.u32 2147483648, %v122_v16  ;;  %v211_v25 = vxor.u32 2147483648, %v123_v17  ;;  %v212_v26 = vxor.u32 2147483648, %v124_v18  ;;  %v127_v28 = vxor.u32 %v119_v21, %v111_v13 }
  0x20   :  { %vm131_vm3 = vcmp.lt.s32.totalorder %v209_v20, 0  ;;  %v128_v29 = vxor.u32 %v120_v22, %v112_v14  ;;  %v213_v30 = vxor.u32 2147483648, %v125_v23  ;;  %v273_v31 = vmov 0.0  }
  0x21   :  { %vm134_vm4 = vcmp.lt.s32.totalorder %v210_v24, 0  ;;  %vm137_vm5 = vcmp.lt.s32.totalorder %v211_v25, 0  ;;  %vm140_vm6 = vcmp.lt.s32.totalorder %v212_v26, 0  ;;  %v153_v32 = vsel %vm131_vm3, 2.0, %v273_v31 }
  0x22   :  { %v154_v33 = vsel %vm134_vm4, 2.0, %v273_v31  ;;  %v155_v34 = vsel %vm137_vm5, 2.0, %v273_v31  ;;  %v156_v35 = vsel %vm140_vm6, 2.0, %v273_v31  ;;  %vm143_vm7 = vcmp.lt.s32.totalorder %v213_v30, 0 }
  0x23   :  { %v171_v36 = vrot.slane %v154_v33, 6  ;;  %v172_v37 = vrot.slane %v155_v34, 4  ;;  %v173_v38 = vrot.slane %v156_v35, 2  ;;  %v214_v39 = vxor.u32 2147483648, %v126_v27 }
  0x24   :  { %v215_v41 = vxor.u32 2147483648, %v127_v28  ;;  %v216_v42 = vxor.u32 2147483648, %v128_v29  ;;  %v157_v45 = vsel %vm143_vm7, 2.0, %v273_v31 }
  0x25   :  { %v178_v43 = vsel %vm177_vm0, %v153_v32, %v171_v36  ;;  %v180_v44 = vsel %vm179_vm1, %v172_v37, %v173_v38  ;;  %vm146_vm8 = vcmp.lt.s32.totalorder %v214_v39, 0 }
  0x26   :  { %v182_v46 = vsel %vm181_vm2, %v178_v43, %v180_v44  ;;  %vm149_vm9 = vcmp.lt.s32.totalorder %v215_v41, 0  ;;  %vm152_vm10 = vcmp.lt.s32.totalorder %v216_v42, 0  ;;  %v158_v47 = vsel %vm146_vm8, 2.0, %v273_v31 }
  0x27   :  { %v188_v48 = vmul.f32 %v182_v46, %v161_v40  ;;  %v159_v49 = vsel %vm149_vm9, 2.0, %v273_v31  ;;  %v160_v50 = vsel %vm152_vm10, 2.0, %v273_v31  ;;  %v174_v51 = vrot.slane %v158_v47, 6 }
  0x28   :  { %v175_v52 = vrot.slane %v159_v49, 4  ;;  %v176_v53 = vrot.slane %v160_v50, 2 }
  0x29   :  { %190 = vst [vmem:[#allocation6] sm:$0xff] %v188_v48  ;;  %v183_v55 = vsel %vm177_vm0, %v157_v45, %v174_v51 }
  0x2a   :  { %v184_v56 = vsel %vm179_vm1, %v175_v52, %v176_v53 }
  0x2b   :  { %v185_v57 = vsel %vm181_vm2, %v183_v55, %v184_v56 }
  0x2c   :  { %v189_v58 = vmul.f32 %v185_v57, %v162_v54 }
  0x2e   :  { %191 = vst [vmem:[#allocation6 + $0x8] sm:$0xff] %v189_v58 }
  0x2f   :  { %202 = dma.vmem_to_hbm [thread:$0]  %s198_s1, 256, %s200_s19, [#allocation5]  }
  0x30   :  { %270 = dma.done.wait [#allocation5], 256  }
  0x31   :  { %271 = vsyncadd [#allocation5], 4294967040 }
  0x32   :  { %207 = vsyncpa [#allocation4], 1 }
  0x33   :  { %208 = vsyncpa [#allocation5], 1 }

</bundles_post_ra>
